<compile_context>
chip_gen: v7x
topology: tpu7x:2x2x1
jax: 0.10.0
libtpu: 0.0.40
codegen_flags: <defaults>
</compile_context>

<pallas_src>
import jax
import jax.numpy as jnp
from jax.experimental import pallas as pl
from jax.experimental.pallas import tpu as pltpu


def _chip_budgets():
    """Return (input-block byte budget, scoped-VMEM limit) for this chip."""
    try:
        vmem_cap = pltpu.get_tpu_info().vmem_capacity_bytes
    except Exception:  # unknown chip / query unavailable -> assume small VMEM
        vmem_cap = 64 * 1024 * 1024
    if vmem_cap <= 64 * 1024 * 1024:
        # v7x-class: 64 MiB per TensorCore.  2x in + 2x out buffers + f32 temps
        # for a 4 MiB bf16 block ~= 24 MiB, comfortably under a 48 MiB limit.
        return 4 * 1024 * 1024, 48 * 1024 * 1024
    # v5e / v6e: 128 MiB physical VMEM -> afford bigger blocks.
    return 8 * 1024 * 1024, 64 * 1024 * 1024


def _largest_divisor(n, cap):
    """Largest divisor of n that is <= cap (at least 1)."""
    cap = max(1, min(n, cap))
    for d in range(cap, 0, -1):
        if n % d == 0:
            return d
    return 1


def _largest_tile_divisor(total, cap):
    """Largest multiple-of-128 divisor of `total` (a multiple of 128) <= cap."""
    cap = max(128, cap)
    best = 128
    d = 128
    limit = min(total, cap)
    while d <= limit:
        if total % d == 0:
            best = d
        d += 128
    return best


def _one_pass(xf, L, tile_b, tile_f, inv_L, vmem_limit):
    """Each block covers all of L: mean + subtract in a single streaming pass."""
    B, _, F_pad = xf.shape
    grid = (B // tile_b, F_pad // tile_f)

    def kernel(x_ref, o_ref):
        # (tile_b, L, tile_f) block.  Stream the f32 cast through the sum only;
        # do NOT materialize a full f32 copy of the block (VMEM + vst traffic).
        mean = jnp.sum(x_ref[...].astype(jnp.float32), axis=1, keepdims=True) * inv_L
        o_ref[...] = x_ref[...] - mean.astype(o_ref.dtype)

    spec = pl.BlockSpec((tile_b, L, tile_f), lambda b, f: (b, 0, f))
    return pl.pallas_call(
        kernel,
        out_shape=jax.ShapeDtypeStruct(xf.shape, xf.dtype),
        grid_spec=pltpu.PrefetchScalarGridSpec(
            num_scalar_prefetch=0, grid=grid, in_specs=[spec], out_specs=spec),
        compiler_params=pltpu.CompilerParams(
            dimension_semantics=("parallel", "parallel"),
            vmem_limit_bytes=vmem_limit),
    )(xf)


def _two_pass(xf, L, tile_f, tile_l, inv_L, vmem_limit):
    """Long-L fallback: pass 1 computes the f32 mean, pass 2 streams the subtract."""
    B, _, F_pad = xf.shape
    grid_l = pl.cdiv(L, tile_l)
    grid_f = F_pad // tile_f
    ragged_l = (L % tile_l) != 0

    # ---- Pass 1: per-(batch, feature) mean over L ("arbitrary" reduction axis).
    def mean_kernel(x_ref, m_ref):
        li = pl.program_id(2)

        @pl.when(li == 0)
        def _():
            m_ref[...] = jnp.zeros_like(m_ref)

        xs = x_ref[...].astype(jnp.float32)              # (1, tile_l, tile_f)
        if ragged_l:
            # Mask rows past the true L in the last (ragged) block.
            row = jax.lax.broadcasted_iota(jnp.int32, xs.shape, 1) + li * tile_l
            xs = jnp.where(row < L, xs, 0.0)
        m_ref[...] += jnp.sum(xs, axis=1, keepdims=True)

        @pl.when(li == pl.num_programs(2) - 1)
        def _():
            m_ref[...] *= inv_L

    mean = pl.pallas_call(
        mean_kernel,
        out_shape=jax.ShapeDtypeStruct((B, 1, F_pad), jnp.float32),
        grid_spec=pltpu.PrefetchScalarGridSpec(
            num_scalar_prefetch=0,
            grid=(B, grid_f, grid_l),
            in_specs=[pl.BlockSpec((1, tile_l, tile_f), lambda b, f, l: (b, l, f))],
            out_specs=pl.BlockSpec((1, 1, tile_f), lambda b, f, l: (b, 0, f))),
        compiler_params=pltpu.CompilerParams(
            dimension_semantics=("parallel", "parallel", "arbitrary"),
            vmem_limit_bytes=vmem_limit),
    )(xf)

    # ---- Pass 2: streaming subtract, fully parallel grid.
    def sub_kernel(x_ref, m_ref, o_ref):
        o_ref[...] = x_ref[...] - m_ref[...].astype(o_ref.dtype)

    x_spec = pl.BlockSpec((1, tile_l, tile_f), lambda b, l, f: (b, l, f))
    m_spec = pl.BlockSpec((1, 1, tile_f), lambda b, l, f: (b, 0, f))
    return pl.pallas_call(
        sub_kernel,
        out_shape=jax.ShapeDtypeStruct(xf.shape, xf.dtype),
        grid_spec=pltpu.PrefetchScalarGridSpec(
            num_scalar_prefetch=0,
            grid=(B, grid_l, grid_f),
            in_specs=[x_spec, m_spec],
            out_specs=x_spec),
        compiler_params=pltpu.CompilerParams(
            dimension_semantics=("parallel", "parallel", "parallel"),
            vmem_limit_bytes=vmem_limit),
    )(xf, mean)


def seq_mean(x, *, block_budget_bytes=None, vmem_limit_bytes=None):
    """x: (B, L, H, D) -> x - mean(x, axis=1, keepdims=True), same shape/dtype."""
    B, L, H, D = x.shape
    F = H * D
    itemsize = jnp.dtype(x.dtype).itemsize

    budget, limit = _chip_budgets()
    if block_budget_bytes is not None:
        budget = block_budget_bytes
    if vmem_limit_bytes is not None:
        limit = vmem_limit_bytes

    # Lane-dense feature view (pure reshape; D is already the minor axis).
    xf = x.reshape(B, L, F)

    # Pad ragged feature axes to a multiple of 128: unmasked lane-dense stores,
    # bounded VMEM.  Padded columns have mean 0 and are sliced away at the end.
    F_pad = pl.cdiv(F, 128) * 128
    if F_pad != F:
        xf = jnp.pad(xf, ((0, 0), (0, 0), (0, F_pad - F)))

    inv_L = 1.0 / L  # compile-time constant: mean = sum * (1/L), no divide

    # Widest 128-multiple feature tile whose full-L column block fits the budget.
    max_tile_f = (budget // (L * itemsize)) // 128 * 128

    if max_tile_f >= 128:
        # --- Single pass: block covers all of L, mean never leaves VMEM. ---
        tile_f = _largest_tile_divisor(F_pad, max_tile_f)   # divides F_pad: no edge blocks
        grid_f = F_pad // tile_f
        # Batch several (L, tile_f) slabs per step when they are small, but keep
        # >= 2 grid steps (when possible) so both v7x TensorCores get work.
        slab_bytes = L * tile_f * itemsize
        cap_b = max(1, budget // slab_bytes)
        if grid_f == 1:
            cap_b = min(cap_b, max(1, B // 2))
        tile_b = _largest_divisor(B, cap_b)                  # divides B: no edge blocks
        out = _one_pass(xf, L, tile_b, tile_f, inv_L, limit)
    else:
        # --- L too long for a full-column block: tile L, two streaming passes. ---
        tile_f = _largest_tile_divisor(F_pad, budget // (8 * itemsize))
        tile_l = max(8, (budget // (tile_f * itemsize)) // 8 * 8)
        if tile_l >= L:
            tile_l = L  # full-dim block is always legal
        out = _two_pass(xf, L, tile_f, tile_l, inv_L, limit)

    if F_pad != F:
        out = out[:, :, :F]
    return out.reshape(B, L, H, D)


if __name__ == "__main__":
    key = jax.random.PRNGKey(0)
    k1, k2, k3 = jax.random.split(key, 3)

    # Case 1: lane-dense feature axis (H*D == 128), float32, single-pass path.
    B, L, H, D = 2, 8, 4, 32
    x = jax.random.normal(k1, (B, L, H, D), dtype=jnp.float32)
    out = jax.block_until_ready(seq_mean(x))
    ref = x - jnp.mean(x, axis=1, keepdims=True)
    assert out.shape == x.shape and out.dtype == x.dtype
    assert jnp.max(jnp.abs(out - ref)) < 1e-5

    # Case 2: ragged feature axis (H*D == 48), bfloat16 (pad-to-128 + f32 accum).
    B2, L2, H2, D2 = 2, 8, 3, 16
    xb = jax.random.normal(k2, (B2, L2, H2, D2), dtype=jnp.float32).astype(jnp.bfloat16)
    outb = jax.block_until_ready(seq_mean(xb))
    xb32 = xb.astype(jnp.float32)
    refb = xb32 - jnp.mean(xb32, axis=1, keepdims=True)
    assert outb.shape == xb.shape and outb.dtype == xb.dtype
    assert jnp.max(jnp.abs(outb.astype(jnp.float32) - refb)) < 5e-2

    # Case 3: long-L two-pass path (forced via a tiny block budget).
    B3, L3, H3, D3 = 2, 512, 1, 128
    xl = jax.random.normal(k3, (B3, L3, H3, D3), dtype=jnp.float32)
    outl = jax.block_until_ready(seq_mean(xl, block_budget_bytes=64 * 1024))
    refl = xl - jnp.mean(xl, axis=1, keepdims=True)
    assert outl.shape == xl.shape and outl.dtype == xl.dtype
    assert jnp.max(jnp.abs(outl - refl)) < 1e-4

    # TODO(synk): if xprof on v7x still shows exposed DMA after block resizing,
    # add pipeline_mode=pl.Buffered(3) on the input BlockSpec (VMEM permitting).
    print("KERNEL_OK")
</pallas_src>

<mosaic_0001>
module attributes {stable_mosaic.version = 11 : i64} {
  func.func @kernel(%arg0: i32, %arg1: i32, %arg2: memref<1x8x128xf32, #tpu.memory_space<vmem>>, %arg3: memref<1x8x128xf32, #tpu.memory_space<vmem>>) attributes {dimension_semantics = [#tpu.dimension_semantics<parallel>, #tpu.dimension_semantics<parallel>], iteration_bounds = array<i64: 2, 1>, scalar_prefetch = 0 : i64, scratch_operands = 0 : i64, tpu.core_type = #tpu.core_type<tc>, window_params = [{transform_indices = @transform_0, window_bounds = array<i64: 1, 8, 128>}, {transform_indices = @transform_1, window_bounds = array<i64: 1, 8, 128>}]} {
    %c0 = arith.constant 0 : index
    %c0_0 = arith.constant 0 : index
    %c0_1 = arith.constant 0 : index
    %0 = vector.load %arg2[%c0, %c0_0, %c0_1] : memref<1x8x128xf32, #tpu.memory_space<vmem>>, vector<1x8x128xf32>
    %cst = arith.constant dense<0.000000e+00> : vector<1x128xf32>
    %1 = vector.multi_reduction <add>, %0, %cst [1] : vector<1x8x128xf32> to vector<1x128xf32>
    %2 = vector.shape_cast %1 : vector<1x128xf32> to vector<1x1x128xf32>
    %cst_2 = arith.constant 1.250000e-01 : f32
    %3 = vector.broadcast %cst_2 : f32 to vector<1x1x128xf32>
    %4 = arith.mulf %2, %3 : vector<1x1x128xf32>
    %c0_3 = arith.constant 0 : index
    %c0_4 = arith.constant 0 : index
    %c0_5 = arith.constant 0 : index
    %5 = vector.load %arg2[%c0_3, %c0_4, %c0_5] : memref<1x8x128xf32, #tpu.memory_space<vmem>>, vector<1x8x128xf32>
    %6 = vector.broadcast %4 : vector<1x1x128xf32> to vector<1x8x128xf32>
    %7 = arith.subf %5, %6 : vector<1x8x128xf32>
    %c0_6 = arith.constant 0 : index
    %c0_7 = arith.constant 0 : index
    %c0_8 = arith.constant 0 : index
    %8 = vector.load %arg3[%c0_6, %c0_7, %c0_8] : memref<1x8x128xf32, #tpu.memory_space<vmem>>, vector<1x8x128xf32>
    tpu.vector_store %arg3[%c0_6, %c0_7, %c0_8], %7 {strides = array<i32>} : memref<1x8x128xf32, #tpu.memory_space<vmem>>, vector<1x8x128xf32>,
    return
  }
  func.func @transform_0(%arg0: i32, %arg1: i32) -> (i32, i32, i32) {
    %c0_i32 = arith.constant 0 : i32
    %c0_i32_0 = arith.constant 0 : i32
    return %arg0, %c0_i32, %arg1 : i32, i32, i32
  }
  func.func @transform_1(%arg0: i32, %arg1: i32) -> (i32, i32, i32) {
    %c0_i32 = arith.constant 0 : i32
    %c0_i32_0 = arith.constant 0 : i32
    return %arg0, %c0_i32, %arg1 : i32, i32, i32
  }
}

</mosaic_0001>

<bundles_post_ra>
// kernel: tpu_custom_call.1
= control target key start
LH: loop header
LB: loop body
LE: loop exit
PB: predicated region body
PF: predicated region fallthrough
CT: control target
= control target key end

     0   :  { %6 = vsyncpa [#allocation3], 0  ;;  %s627_s0 = inlined_call_operand.hbm [shape: f32[2,8,128], index: 0, kind: input, shape index: {}]   ;;  %s628_s1 = inlined_call_operand.hbm [shape: f32[2,8,128], index: 1, kind: output, shape index: {}]  }
   0x1   :  { %8 = vsyncpa [#allocation3 + $0x1], 0 }
   0x2   :  { %9 = vsyncpa [#allocation4], 0 }
   0x3   :  { %11 = vsyncpa [#allocation4 + $0x1], 0  ;;  %s455_s6 = smov 0   ;;  %s457_s7 = smov 0  }
   0x4   :  { %s459_s8 = smov 0   ;;  %s461_s9 = smov 0  }
   0x5   :  { %s463_s10 = smov 0   ;;  %s465_s11 = smov 0  }
   0x6 LB: > { %s254_s12 = sadd.s32 4294967295, %s441_s11   ;;  %s255_s13 = sadd.s32 4294967294, %s441_s11   ;;  %s441_s11 = sphi %s465_s11, %s17_s11   ;;  %s437_s10 = sphi %s463_s10, %s644_s10   ;;  %s433_s9 = sphi %s461_s9, %s643_s9   ;;  %s429_s8 = sphi %s459_s8, %s642_s8   ;;  %s425_s7 = sphi %s457_s7, %s641_s7   ;;  %s421_s6 = sphi %s455_s6, %s640_s6  }
   0x7   : > { %s29_s14 = sadd.s32 1, %s437_s10  ;;  %s38_s15 = sadd.s32 1, %s429_s8 }
   0x8   : > { %p31_p0 = scmp.ge.s32.totalorder %s29_s14, 2  ;;  %p45_p1 = scmp.ne.s32.totalorder %s429_s8, %s425_s7 }
   0x9   : > { %p46_p2 = scmp.eq.s32.totalorder %s441_s11, 0  ;;  %p51_p3 = scmp.ne.s32.totalorder %s425_s7, %s421_s6 }
   0xa   : > { %s646_s14 = smov (%p31_p0, %s29_s14), 0  ;;  %p52_p5 = scmp.eq.s32.totalorder %s254_s12, 0 }
   0xb   : > { %p496_p4 = por %p46_p2, %p45_p1  ;;  %s33_s17 = ssub.s32 %s437_s10, %s646_s14 }
   0xc   : > { %p77_p6 = scmp.eq.s32.totalorder %s254_s12, 1  ;;  %p36_p7 = scmp.eq.s32.totalorder %s33_s17, 0 }
   0xd   : > { %p502_p8 = por %p52_p5, %p51_p3  ;;  %p83_p10 = scmp.eq.s32.totalorder %s255_s13, 1 }
   0xe   : > { %p506_p9 = por %p77_p6, %p45_p1  ;;  %p279_p13 = scmp.lt.s32.totalorder %s441_s11, 2 }
   0xf   : > { %s511_s20 = scalar_select %p36_p7, %s429_s8, %s38_s15  }
  0x10   : > { %s632_s19 = scalar_select %p506_p9, 1, 0 }
  0x11   : > { %p513_p11 = por %p83_p10, %p51_p3  ;;  %s103_s22 = sand.u32 1, %s429_s8  }
  0x12   : > { %s258_s23 = sshll.u32 %s103_s22, 3  ;;  %s259_s24 = sshll.u32 %s437_s10, 7 }
  0x13   : > { %s633_s21 = scalar_select %p513_p11, 1, 0 }
  0x14   : > { %s524_s27 = scalar_lea.hbm %s627_s0, %s259_s24  ;;  %s107_s28 = scalar_lea.vmem [#allocation2], %s258_s23 }
  0x15   : > { %s115_s29 = sshll.u32 %s107_s28, 4  ;;  %p530_p0 = pnand %p279_p13, %p496_p4  ;;  %s526_s29 = int_to_ptr.vmem [resolvable:$true] %s115_s29 }
  0x16   : > { %s104_s2 = scalar_lea.sflag [#allocation3], %s103_s22  ;;  %s329_s3 = scalar_lea.hbm %s524_s27, 128 }
  0x17   : > { %p330_p3 = scmp.ne.s32.totalorder %s524_s27, %s329_s3  ;;  %p331_p5 = pneg %p530_p0 }
  0x18   : > { %s334_s12 = scalar_lea.hbm %s627_s0, 256  ;;  %p335_p4 = scmp.lt.u32.totalorder %s524_s27, %s627_s0 }
  0x19   : > { %p332_p6 = pnand %p331_p5, %p330_p3  ;;  %p336_p10 = scmp.lt.u32.totalorder %s334_s12, %s329_s3 }
  0x1a   : > { %p338_p12 = scmp.lt.u32.totalorder %s329_s3, %s524_s27 }
  0x1b   : > { %p333_p7 = pneg %p332_p6  ;;  %p337_p13 = por %p336_p10, %p335_p4 }
  0x1d   : > { %p339_p1 = por %p338_p12, %p337_p13 }
  0x1f   : > { %p340_p2 = pnand %p339_p1, %p333_p7 }
  0x21   : > { %343 = shalt.err (!%p340_p2)
}
  0x22   : > { %s344_s16 = scalar_lea.vmem %s526_s29, 128  ;;  %s443_s17 = smov [#allocation2]  }
  0x23   : > { %p345_p3 = scmp.ne.s32.totalorder %s526_s29, %s344_s16  ;;  %s349_s22 = sshll.u32 %s443_s17, 4  ;;  %s350_s22 = int_to_ptr.vmem [resolvable:$false] %s349_s22 }
  0x24   : > { %s351_s23 = scalar_lea.vmem %s350_s22, 256  ;;  %p352_p9 = scmp.lt.s32.totalorder %s526_s29, %s350_s22 }
  0x25   : > { %p347_p6 = pnand %p345_p3, %p331_p5  ;;  %p353_p4 = scmp.lt.s32.totalorder %s351_s23, %s344_s16 }
  0x27   : > { %p348_p11 = pneg %p347_p6  ;;  %p354_p10 = por %p353_p4, %p352_p9 }
  0x29   : > { %p355_p12 = pnand %p354_p10, %p348_p11 }
  0x2b   : > { %358 = shalt.err (!%p355_p12)
}
  0x2c   : > { %274 = dma.hbm_to_vmem [thread:$0]  (!%p530_p0), %s524_s27, 128, %s526_s29, %s104_s2  }
  0x2d   : > { %p635_p1 = scmp.lt.s32.totalorder %s441_s11, 3  ;;  %p636_p2 = scmp.ge.s32.totalorder %s441_s11, 1 }
  0x2f   : > { %p121_p5 = pnand %p636_p2, %p635_p1 }
  0x30   : > { %s566_s24 = sand.u32 (!%p121_p5), 1, %s425_s7  }
  0x31   : > { %124 = sbr.rel (%p121_p5) target bundleno = 88 (0x58), region = 24  ;;  %s261_s25 = sshll.u32 (!%p121_p5), %s566_s24, 3 }
  0x32   : > { %s127_s26 = scalar_lea.sflag (!%p121_p5), [#allocation3], %s566_s24  ;;  %s130_s28 = scalar_lea.vmem (!%p121_p5), [#allocation2], %s261_s25 }
  0x38   : > { %412 = dma.done.wait (%p502_p8), %s127_s26, 128  }
  0x39   : > { %414 = vsyncadd (%p502_p8), %s127_s26, 4294967168  ;;  %v149_v0 = vld [vmem:[%s130_s28] sm:$0xff]  ;;  %s148_s27 = scalar_lea.vmem [#allocation5], %s261_s25  ;;  %s264_s30 = sshll.u32 %s433_s9, 7 }
  0x3a   : > { %v150_v1 = vrot.slane %v149_v0, 4  ;;  %s174_s29 = sshll.u32 %s148_s27, 4  ;;  %s580_s3 = scalar_lea.hbm %s628_s1, %s264_s30  ;;  %s575_s29 = int_to_ptr.vmem [resolvable:$true] %s174_s29 }
  0x3b   : > { %s160_s4 = scalar_lea.sflag [#allocation4], %s566_s24  ;;  %s359_s5 = scalar_lea.vmem %s575_s29, 128 }
  0x3c   : > { %v151_v2 = vadd.f32 %v150_v1, %v149_v0  ;;  %p360_p8 = scmp.ne.s32.totalorder %s575_s29, %s359_s5  ;;  %p637_p9 = scmp.ne.s32.totalorder %s632_s19, 0 }
  0x3d   : > { %s444_s9 = smov [#allocation5]  }
  0x3e   : > { %v152_v3 = vrot.slane %v151_v2, 2  ;;  %p361_p11 = pnand %p360_p8, %p637_p9  ;;  %s363_s12 = sshll.u32 %s444_s9, 4  ;;  %s364_s12 = int_to_ptr.vmem [resolvable:$false] %s363_s12 }
  0x3f   : > { %s365_s13 = scalar_lea.vmem %s364_s12, 256  ;;  %p366_p7 = scmp.lt.s32.totalorder %s575_s29, %s364_s12 }
  0x40   : > { %v153_v4 = vadd.f32 %v152_v3, %v151_v2  ;;  %p362_p0 = pneg %p361_p11  ;;  %p367_p13 = scmp.lt.s32.totalorder %s365_s13, %s359_s5 }
  0x42   : > { %v154_v5 = vrot.slane %v153_v4, 1  ;;  %p368_p3 = por %p367_p13, %p366_p7 }
  0x44   : > { %v155_v6 = vadd.f32 %v154_v5, %v153_v4  ;;  %p369_p6 = pnand %p368_p3, %p362_p0 }
  0x46   : > { %v156_v7 = vmul.f32 0.125, %v155_v6 }
  0x48   : > { %v157_v8 = vsub.f32 %v149_v0, %v156_v7 }
  0x4a   : > { %158 = vst [vmem:[%s148_s27] sm:$0xff] %v157_v8 }
  0x4b   : > { %372 = shalt.err (!%p369_p6)
}
  0x4c   : > { %s373_s15 = scalar_lea.hbm %s580_s3, 128  ;;  %s377_s22 = scalar_lea.hbm %s628_s1, 256 }
  0x4d   : > { %p374_p4 = scmp.ne.s32.totalorder %s580_s3, %s373_s15  ;;  %p378_p1 = scmp.lt.u32.totalorder %s580_s3, %s628_s1 }
  0x4e   : > { %p379_p2 = scmp.lt.u32.totalorder %s377_s22, %s373_s15  ;;  %p381_p8 = scmp.lt.u32.totalorder %s373_s15, %s580_s3 }
  0x4f   : > { %p375_p10 = pnand %p374_p4, %p637_p9 }
  0x50   : > { %p380_p5 = por %p379_p2, %p378_p1 }
  0x51   : > { %p376_p12 = pneg %p375_p10 }
  0x52   : > { %p382_p11 = por %p381_p8, %p380_p5 }
  0x54   : > { %p383_p0 = pnand %p382_p11, %p376_p12 }
  0x56   : > { %386 = shalt.err (!%p383_p0)
}
  0x57   : > { %269 = dma.vmem_to_hbm [thread:$0]  (%p637_p9), %s575_s29, 128, %s580_s3, %s160_s4  }
  0x58 PF: > { %s186_s25 = sand.u32 1, %s421_s6   ;;  %p638_p7 = scmp.ne.s32.totalorder %s633_s21, 0 }
  0x59   : > { %p639_p13 = scmp.ge.s32.totalorder %s441_s11, 2  ;;  %s187_s26 = scalar_lea.sflag [#allocation4], %s186_s25 }
  0x5b   : > { %p276_p3 = pnand %p639_p13, %p638_p7 }
  0x5d   : > { %416 = dma.done.wait (!%p276_p3), %s187_s26, 128  }
  0x5e   : > { %418 = vsyncadd (!%p276_p3), %s187_s26, 4294967168  ;;  %s17_s11 = sadd.s32 1, %s441_s11   ;;  %s640_s6 = smov %s425_s7 }
  0x5f   : > { %p14_p6 = scmp.ge.s32.totalorder %s17_s11, 4   ;;  %s641_s7 = smov %s429_s8 }
  0x60   : > { %s642_s8 = smov %s511_s20  ;;  %s643_s9 = smov %s437_s10 }
  0x61   : > { %s644_s10 = smov %s646_s14  ;;  %16 = sbr.rel (!%p14_p6) target bundleno = 6 (0x6), region = 69 }
  0x68   :  { %192 = vsyncpa [#allocation3], 1 }
  0x69   :  { %194 = vsyncpa [#allocation3 + $0x1], 1 }
  0x6a   :  { %195 = vsyncpa [#allocation4], 1 }
  0x6b   :  { %197 = vsyncpa [#allocation4 + $0x1], 1 }

</bundles_post_ra>
